<compile_context>
chip_gen: v6e
topology: v6e:2x2x1
jax: 0.10.0
libtpu: 0.0.40
codegen_flags: <defaults>
</compile_context>

<pallas_src>
import jax
import jax.numpy as jnp
from jax.experimental import pallas as pl
from jax.experimental.pallas import tpu as pltpu

LANE = 128


def _round_up(n, m):
    return ((n + m - 1) // m) * m


def _pad_axis(a, axis, target):
    pad = target - a.shape[axis]
    if pad == 0:
        return a
    widths = [(0, 0)] * a.ndim
    widths[axis] = (0, pad)
    return jnp.pad(a, widths)


# ----------------------------------------------------------------------------
# Kernels
# ----------------------------------------------------------------------------
def _mlp_kernel_direct(x_ref, w1_ref, b1_ref, w2_ref, b2_ref, w3_ref, b3_ref,
                       o_ref):
    # x arrives in its storage dtype (f32); cast to the MXU input dtype here.
    x = x_ref[...].astype(w1_ref.dtype)
    h1 = jnp.dot(x, w1_ref[...], preferred_element_type=jnp.float32)
    h1 = jnp.maximum(h1 + b1_ref[...], 0.0).astype(w2_ref.dtype)
    h2 = jnp.dot(h1, w2_ref[...], preferred_element_type=jnp.float32)
    h2 = jnp.maximum(h2 + b2_ref[...], 0.0).astype(w3_ref.dtype)
    out = jnp.dot(h2, w3_ref[...], preferred_element_type=jnp.float32)
    o_ref[...] = (out + b3_ref[...]).astype(o_ref.dtype)


def _mlp_kernel_scratch(x_ref, w1_ref, b1_ref, w2_ref, b2_ref, w3_ref, b3_ref,
                        o_ref, h2_ref):
    # Same as above, but h2 staged through VMEM scratch to bound vreg
    # pressure at large batch tiles.
    x = x_ref[...].astype(w1_ref.dtype)
    h1 = jnp.dot(x, w1_ref[...], preferred_element_type=jnp.float32)
    h1 = jnp.maximum(h1 + b1_ref[...], 0.0).astype(w2_ref.dtype)
    h2 = jnp.dot(h1, w2_ref[...], preferred_element_type=jnp.float32)
    h2_ref[...] = jnp.maximum(h2 + b2_ref[...], 0.0).astype(h2_ref.dtype)
    out = jnp.dot(h2_ref[...], w3_ref[...], preferred_element_type=jnp.float32)
    o_ref[...] = (out + b3_ref[...]).astype(o_ref.dtype)


# ----------------------------------------------------------------------------
# One-time parameter preparation (hoisted out of the forward hot path)
# ----------------------------------------------------------------------------
def prepare_params(w1, b1, w2, b2, w3, b3, *, compute_dtype=jnp.bfloat16):
    """Pads every feature dim to a multiple of 128 lanes and casts weights to
    the MXU compute dtype.  Call ONCE at init; do not call per forward step."""
    d_in, _ = w1.shape
    h1_dim = w1.shape[1]
    h2_dim = w2.shape[1]          # 252 in the PyTorch module
    d_out = w3.shape[1]

    d_in_p = _round_up(d_in, LANE)
    h1_p = _round_up(h1_dim, LANE)
    h2_p = _round_up(h2_dim, LANE)      # 252 -> 256
    d_out_p = _round_up(d_out, LANE)    # 10  -> 128 (lane-dense stores)

    f32 = jnp.float32
    w1p = _pad_axis(_pad_axis(w1, 0, d_in_p), 1, h1_p).astype(compute_dtype)
    w2p = _pad_axis(_pad_axis(w2, 0, h1_p), 1, h2_p).astype(compute_dtype)
    w3p = _pad_axis(_pad_axis(w3, 0, h2_p), 1, d_out_p).astype(compute_dtype)
    b1p = _pad_axis(b1.reshape(1, -1), 1, h1_p).astype(f32)
    b2p = _pad_axis(b2.reshape(1, -1), 1, h2_p).astype(f32)
    b3p = _pad_axis(b3.reshape(1, -1), 1, d_out_p).astype(f32)
    return (w1p, b1p, w2p, b2p, w3p, b3p), d_out


# ----------------------------------------------------------------------------
# Forward pass
# ----------------------------------------------------------------------------
def mlp_forward(x, padded_params, d_out, *, block_batch=1024,
                out_dtype=jnp.float32, return_padded=False,
                scratch_threshold=256):
    """3-layer MLP forward with a batch-tiled Pallas kernel.

    `padded_params` must come from prepare_params().  Weights are stored
    (in_features, out_features) (transposed vs. PyTorch); biases (1, out)."""
    w1p, b1p, w2p, b2p, w3p, b3p = padded_params
    compute_dtype = w1p.dtype
    B, d_in = x.shape
    d_in_p, h1_p = w1p.shape
    h2_p = w2p.shape[1]
    d_out_p = w3p.shape[1]

    # Row granularity: bf16 packs 16 rows per sublane group.
    row = 16 if compute_dtype == jnp.bfloat16 else 8

    # Batch tile: big tiles amortize the ~0.35us/step overhead; the working
    # set at tm=1024 is only a few MB (far under VMEM on all generations).
    tm = min(block_batch, _round_up(B, row))
    # Guarantee >= 2 grid steps when the batch allows it, so the "parallel"
    # axis actually shards across both TensorCores on dual-TC chips (v7x).
    if B > row and _round_up(B, tm) // tm < 2:
        tm = max(row, _round_up((B + 1) // 2, row))
    b_p = _round_up(B, tm)
    grid = (b_p // tm,)

    # Pad x only when actually needed; keep its storage dtype (cast in-kernel).
    xp = x
    if d_in != d_in_p or B != b_p:
        xp = _pad_axis(_pad_axis(x, 1, d_in_p), 0, b_p)

    use_scratch = tm > scratch_threshold
    kernel = _mlp_kernel_scratch if use_scratch else _mlp_kernel_direct
    scratch_shapes = ([pltpu.VMEM((tm, h2_p), compute_dtype)]
                      if use_scratch else [])

    x_item = xp.dtype.itemsize
    c_item = jnp.dtype(compute_dtype).itemsize
    weight_bytes = ((w1p.size + w2p.size + w3p.size) * c_item
                    + (b1p.size + b2p.size + b3p.size) * 4)

    # Only set an explicit VMEM limit when the estimate approaches v5e's
    # 16 MiB default scoped limit (f32 compute or very large tiles).
    vmem_est = (2 * tm * d_in_p * x_item          # x, double-buffered
                + 2 * tm * d_out_p * c_item       # out, double-buffered
                + 2 * weight_bytes                # worst case (double-buffered)
                + (tm * h2_p * c_item if use_scratch else 0))
    compiler_kwargs = dict(dimension_semantics=("parallel",))
    if vmem_est > 12 * (1 << 20):
        compiler_kwargs["vmem_limit_bytes"] = int(min(2 * vmem_est, 64 << 20))

    flops = 2 * b_p * (d_in_p * h1_p + h1_p * h2_p + h2_p * d_out_p)
    bytes_accessed = xp.size * x_item + weight_bytes + b_p * d_out_p * c_item
    cost = pl.CostEstimate(flops=flops, transcendentals=0,
                           bytes_accessed=bytes_accessed)

    def build(single_buffer_weights):
        if single_buffer_weights:
            # Constant block index -> DMA'd once; no second pipeline buffer.
            def wspec(shape):
                return pl.BlockSpec(shape, lambda i: (0, 0),
                                    pipeline_mode=pl.Buffered(1))
        else:
            def wspec(shape):
                return pl.BlockSpec(shape, lambda i: (0, 0))
        return pl.pallas_call(
            kernel,
            out_shape=jax.ShapeDtypeStruct((b_p, d_out_p), compute_dtype),
            grid=grid,
            in_specs=[
                # x: tiled over the batch; double-buffered by the pipeline.
                pl.BlockSpec((tm, d_in_p), lambda i: (i, 0)),
                # weights / biases: VMEM-resident across all batch tiles.
                wspec((d_in_p, h1_p)),
                wspec((1, h1_p)),
                wspec((h1_p, h2_p)),
                wspec((1, h2_p)),
                wspec((h2_p, d_out_p)),
                wspec((1, d_out_p)),
            ],
            out_specs=pl.BlockSpec((tm, d_out_p), lambda i: (i, 0)),
            scratch_shapes=scratch_shapes,
            compiler_params=pltpu.CompilerParams(**compiler_kwargs),
            cost_estimate=cost,
        )

    args = (xp, w1p, b1p, w2p, b2p, w3p, b3p)
    try:
        out_p = build(True)(*args)
    except Exception:
        # Fallback if this JAX build rejects pipeline_mode on BlockSpec.
        out_p = build(False)(*args)

    if return_padded:
        # Let the caller defer the slice to the very end of the model.
        return out_p
    # Strip batch / lane padding and upcast in one small trailing op.
    return out_p[:B, :d_out].astype(out_dtype)


# ----------------------------------------------------------------------------
# Init + pure-JAX reference
# ----------------------------------------------------------------------------
def init_params(key, input_dim, hidden_dim, output_dim):
    # PyTorch-Linear-style uniform init U[-1/sqrt(fan_in), +1/sqrt(fan_in)].
    # The module hard-codes the second hidden width to 252 (padded to 256
    # internally by prepare_params, which is exact).
    dims = [(input_dim, hidden_dim), (hidden_dim, 252), (252, output_dim)]
    params = []
    for (fan_in, fan_out) in dims:
        key, kw, kb = jax.random.split(key, 3)
        bound = 1.0 / (fan_in ** 0.5)
        w = jax.random.uniform(kw, (fan_in, fan_out), jnp.float32, -bound, bound)
        b = jax.random.uniform(kb, (1, fan_out), jnp.float32, -bound, bound)
        params.extend([w, b])
    return params


def _ref_forward(x, w1, b1, w2, b2, w3, b3, compute_dtype=jnp.bfloat16):
    # Pure-JAX reference using the same precision recipe as the kernel
    # (bf16 matmul inputs, f32 accumulation, f32 bias/ReLU, bf16 output store).
    c = lambda a: a.astype(compute_dtype)
    h1 = jnp.maximum(
        jnp.dot(c(x), c(w1), preferred_element_type=jnp.float32) + b1, 0.0)
    h2 = jnp.maximum(
        jnp.dot(c(h1), c(w2), preferred_element_type=jnp.float32) + b2, 0.0)
    out = jnp.dot(c(h2), c(w3), preferred_element_type=jnp.float32) + b3
    return out.astype(compute_dtype).astype(jnp.float32)


if __name__ == "__main__":
    key = jax.random.PRNGKey(0)
    batch, input_dim, hidden_dim, output_dim = 8, 128, 64, 10

    kx, kp = jax.random.split(key)
    x = jax.random.normal(kx, (batch, input_dim), jnp.float32)
    w1, b1, w2, b2, w3, b3 = init_params(kp, input_dim, hidden_dim, output_dim)

    # One-time weight padding / casting (outside the per-call hot path).
    padded_params, d_out = prepare_params(w1, b1, w2, b2, w3, b3)
    padded_params = jax.block_until_ready(padded_params)

    out = mlp_forward(x, padded_params, d_out)
    out = jax.block_until_ready(out)
    assert out.shape == (batch, output_dim)

    ref = _ref_forward(x, w1, b1, w2, b2, w3, b3)
    assert jnp.allclose(out, ref, atol=3e-3, rtol=3e-3), (
        "kernel output does not match reference")

    print("KERNEL_OK")
</pallas_src>

<mosaic_0001>
module attributes {stable_mosaic.version = 11 : i64} {
  func.func @_mlp_kernel_direct(%arg0: i32, %arg1: memref<16x128xf32, #tpu.memory_space<vmem>>, %arg2: memref<128x128xbf16, #tpu.memory_space<vmem>>, %arg3: memref<1x128xf32, #tpu.memory_space<vmem>>, %arg4: memref<128x256xbf16, #tpu.memory_space<vmem>>, %arg5: memref<1x256xf32, #tpu.memory_space<vmem>>, %arg6: memref<256x128xbf16, #tpu.memory_space<vmem>>, %arg7: memref<1x128xf32, #tpu.memory_space<vmem>>, %arg8: memref<16x128xbf16, #tpu.memory_space<vmem>>) attributes {dimension_semantics = [#tpu.dimension_semantics<parallel>], iteration_bounds = array<i64: 1>, scalar_prefetch = 0 : i64, scratch_operands = 0 : i64, tpu.core_type = #tpu.core_type<tc>, window_params = [{transform_indices = @transform_0, window_bounds = array<i64: 16, 128>}, {pipeline_mode = #tpu.pipeline_mode<synchronous>, transform_indices = @transform_1, window_bounds = array<i64: 128, 128>}, {pipeline_mode = #tpu.pipeline_mode<synchronous>, transform_indices = @transform_2, window_bounds = array<i64: 1, 128>}, {pipeline_mode = #tpu.pipeline_mode<synchronous>, transform_indices = @transform_3, window_bounds = array<i64: 128, 256>}, {pipeline_mode = #tpu.pipeline_mode<synchronous>, transform_indices = @transform_4, window_bounds = array<i64: 1, 256>}, {pipeline_mode = #tpu.pipeline_mode<synchronous>, transform_indices = @transform_5, window_bounds = array<i64: 256, 128>}, {pipeline_mode = #tpu.pipeline_mode<synchronous>, transform_indices = @transform_6, window_bounds = array<i64: 1, 128>}, {transform_indices = @transform_7, window_bounds = array<i64: 16, 128>}]} {
    %c0 = arith.constant 0 : index
    %c0_0 = arith.constant 0 : index
    %0 = vector.load %arg1[%c0, %c0_0] : memref<16x128xf32, #tpu.memory_space<vmem>>, vector<16x128xf32>
    %1 = arith.truncf %0 : vector<16x128xf32> to vector<16x128xbf16>
    %c0_1 = arith.constant 0 : index
    %c0_2 = arith.constant 0 : index
    %2 = vector.load %arg2[%c0_1, %c0_2] : memref<128x128xbf16, #tpu.memory_space<vmem>>, vector<128x128xbf16>
    %cst = arith.constant dense<0.000000e+00> : vector<16x128xf32>
    %3 = tpu.matmul %1, %2, %cst {dimension_numbers = #tpu.dot_dimension_numbers<[1], [0], [0], [1], [0, 0, 1, 1], [], []>} : vector<16x128xbf16>, vector<128x128xbf16>, vector<16x128xf32> -> vector<16x128xf32>
    %c0_3 = arith.constant 0 : index
    %c0_4 = arith.constant 0 : index
    %4 = vector.load %arg3[%c0_3, %c0_4] : memref<1x128xf32, #tpu.memory_space<vmem>>, vector<1x128xf32>
    %5 = vector.broadcast %4 : vector<1x128xf32> to vector<16x128xf32>
    %6 = arith.addf %3, %5 : vector<16x128xf32>
    %cst_5 = arith.constant 0.000000e+00 : f32
    %7 = vector.broadcast %cst_5 : f32 to vector<16x128xf32>
    %8 = arith.maximumf %6, %7 : vector<16x128xf32>
    %9 = arith.truncf %8 : vector<16x128xf32> to vector<16x128xbf16>
    %c0_6 = arith.constant 0 : index
    %c0_7 = arith.constant 0 : index
    %10 = vector.load %arg4[%c0_6, %c0_7] : memref<128x256xbf16, #tpu.memory_space<vmem>>, vector<128x256xbf16>
    %cst_8 = arith.constant dense<0.000000e+00> : vector<16x256xf32>
    %11 = tpu.matmul %9, %10, %cst_8 {dimension_numbers = #tpu.dot_dimension_numbers<[1], [0], [0], [1], [0, 0, 1, 1], [], []>} : vector<16x128xbf16>, vector<128x256xbf16>, vector<16x256xf32> -> vector<16x256xf32>
    %c0_9 = arith.constant 0 : index
    %c0_10 = arith.constant 0 : index
    %12 = vector.load %arg5[%c0_9, %c0_10] : memref<1x256xf32, #tpu.memory_space<vmem>>, vector<1x256xf32>
    %13 = vector.broadcast %12 : vector<1x256xf32> to vector<16x256xf32>
    %14 = arith.addf %11, %13 : vector<16x256xf32>
    %cst_11 = arith.constant 0.000000e+00 : f32
    %15 = vector.broadcast %cst_11 : f32 to vector<16x256xf32>
    %16 = arith.maximumf %14, %15 : vector<16x256xf32>
    %17 = arith.truncf %16 : vector<16x256xf32> to vector<16x256xbf16>
    %c0_12 = arith.constant 0 : index
    %c0_13 = arith.constant 0 : index
    %18 = vector.load %arg6[%c0_12, %c0_13] : memref<256x128xbf16, #tpu.memory_space<vmem>>, vector<256x128xbf16>
    %cst_14 = arith.constant dense<0.000000e+00> : vector<16x128xf32>
    %19 = tpu.matmul %17, %18, %cst_14 {dimension_numbers = #tpu.dot_dimension_numbers<[1], [0], [0], [1], [0, 0, 1, 1], [], []>} : vector<16x256xbf16>, vector<256x128xbf16>, vector<16x128xf32> -> vector<16x128xf32>
    %c0_15 = arith.constant 0 : index
    %c0_16 = arith.constant 0 : index
    %20 = vector.load %arg7[%c0_15, %c0_16] : memref<1x128xf32, #tpu.memory_space<vmem>>, vector<1x128xf32>
    %21 = vector.broadcast %20 : vector<1x128xf32> to vector<16x128xf32>
    %22 = arith.addf %19, %21 : vector<16x128xf32>
    %23 = arith.truncf %22 : vector<16x128xf32> to vector<16x128xbf16>
    %c0_17 = arith.constant 0 : index
    %c0_18 = arith.constant 0 : index
    %24 = vector.load %arg8[%c0_17, %c0_18] : memref<16x128xbf16, #tpu.memory_space<vmem>>, vector<16x128xbf16>
    tpu.vector_store %arg8[%c0_17, %c0_18], %23 {strides = array<i32>} : memref<16x128xbf16, #tpu.memory_space<vmem>>, vector<16x128xbf16>,
    return
  }
  func.func @transform_0(%arg0: i32) -> (i32, i32) {
    %c0_i32 = arith.constant 0 : i32
    %c0_i32_0 = arith.constant 0 : i32
    return %arg0, %c0_i32 : i32, i32
  }
  func.func @transform_1(%arg0: i32) -> (i32, i32) {
    %c0_i32 = arith.constant 0 : i32
    %c0_i32_0 = arith.constant 0 : i32
    %c0_i32_1 = arith.constant 0 : i32
    return %c0_i32, %c0_i32_0 : i32, i32
  }
  func.func @transform_2(%arg0: i32) -> (i32, i32) {
    %c0_i32 = arith.constant 0 : i32
    %c0_i32_0 = arith.constant 0 : i32
    %c0_i32_1 = arith.constant 0 : i32
    return %c0_i32, %c0_i32_0 : i32, i32
  }
  func.func @transform_3(%arg0: i32) -> (i32, i32) {
    %c0_i32 = arith.constant 0 : i32
    %c0_i32_0 = arith.constant 0 : i32
    %c0_i32_1 = arith.constant 0 : i32
    return %c0_i32, %c0_i32_0 : i32, i32
  }
  func.func @transform_4(%arg0: i32) -> (i32, i32) {
    %c0_i32 = arith.constant 0 : i32
    %c0_i32_0 = arith.constant 0 : i32
    %c0_i32_1 = arith.constant 0 : i32
    return %c0_i32, %c0_i32_0 : i32, i32
  }
  func.func @transform_5(%arg0: i32) -> (i32, i32) {
    %c0_i32 = arith.constant 0 : i32
    %c0_i32_0 = arith.constant 0 : i32
    %c0_i32_1 = arith.constant 0 : i32
    return %c0_i32, %c0_i32_0 : i32, i32
  }
  func.func @transform_6(%arg0: i32) -> (i32, i32) {
    %c0_i32 = arith.constant 0 : i32
    %c0_i32_0 = arith.constant 0 : i32
    %c0_i32_1 = arith.constant 0 : i32
    return %c0_i32, %c0_i32_0 : i32, i32
  }
  func.func @transform_7(%arg0: i32) -> (i32, i32) {
    %c0_i32 = arith.constant 0 : i32
    %c0_i32_0 = arith.constant 0 : i32
    return %arg0, %c0_i32 : i32, i32
  }
}

module attributes {stable_mosaic.version = 11 : i64} {
  func.func @_mlp_kernel_direct(%arg0: i32, %arg1: memref<16x128xf32, #tpu.memory_space<vmem>>, %arg2: memref<128x128xbf16, #tpu.memory_space<vmem>>, %arg3: memref<1x128xf32, #tpu.memory_space<vmem>>, %arg4: memref<128x256xbf16, #tpu.memory_space<vmem>>, %arg5: memref<1x256xf32, #tpu.memory_space<vmem>>, %arg6: memref<256x128xbf16, #tpu.memory_space<vmem>>, %arg7: memref<1x128xf32, #tpu.memory_space<vmem>>, %arg8: memref<16x128xbf16, #tpu.memory_space<vmem>>) attributes {dimension_semantics = [#tpu.dimension_semantics<parallel>], iteration_bounds = array<i64: 1>, scalar_prefetch = 0 : i64, scratch_operands = 0 : i64, tpu.core_type = #tpu.core_type<tc>, window_params = [{transform_indices = @transform_0, window_bounds = array<i64: 16, 128>}, {pipeline_mode = #tpu.pipeline_mode<synchronous>, transform_indices = @transform_1, window_bounds = array<i64: 128, 128>}, {pipeline_mode = #tpu.pipeline_mode<synchronous>, transform_indices = @transform_2, window_bounds = array<i64: 1, 128>}, {pipeline_mode = #tpu.pipeline_mode<synchronous>, transform_indices = @transform_3, window_bounds = array<i64: 128, 256>}, {pipeline_mode = #tpu.pipeline_mode<synchronous>, transform_indices = @transform_4, window_bounds = array<i64: 1, 256>}, {pipeline_mode = #tpu.pipeline_mode<synchronous>, transform_indices = @transform_5, window_bounds = array<i64: 256, 128>}, {pipeline_mode = #tpu.pipeline_mode<synchronous>, transform_indices = @transform_6, window_bounds = array<i64: 1, 128>}, {transform_indices = @transform_7, window_bounds = array<i64: 16, 128>}]} {
    %c0 = arith.constant 0 : index
    %c0_0 = arith.constant 0 : index
    %0 = vector.load %arg1[%c0, %c0_0] : memref<16x128xf32, #tpu.memory_space<vmem>>, vector<16x128xf32>
    %1 = arith.truncf %0 : vector<16x128xf32> to vector<16x128xbf16>
    %c0_1 = arith.constant 0 : index
    %c0_2 = arith.constant 0 : index
    %2 = vector.load %arg2[%c0_1, %c0_2] : memref<128x128xbf16, #tpu.memory_space<vmem>>, vector<128x128xbf16>
    %cst = arith.constant dense<0.000000e+00> : vector<16x128xf32>
    %3 = tpu.matmul %1, %2, %cst {dimension_numbers = #tpu.dot_dimension_numbers<[1], [0], [0], [1], [0, 0, 1, 1], [], []>} : vector<16x128xbf16>, vector<128x128xbf16>, vector<16x128xf32> -> vector<16x128xf32>
    %c0_3 = arith.constant 0 : index
    %c0_4 = arith.constant 0 : index
    %4 = vector.load %arg3[%c0_3, %c0_4] : memref<1x128xf32, #tpu.memory_space<vmem>>, vector<1x128xf32>
    %5 = vector.broadcast %4 : vector<1x128xf32> to vector<16x128xf32>
    %6 = arith.addf %3, %5 : vector<16x128xf32>
    %cst_5 = arith.constant 0.000000e+00 : f32
    %7 = vector.broadcast %cst_5 : f32 to vector<16x128xf32>
    %8 = arith.maximumf %6, %7 : vector<16x128xf32>
    %9 = arith.truncf %8 : vector<16x128xf32> to vector<16x128xbf16>
    %c0_6 = arith.constant 0 : index
    %c0_7 = arith.constant 0 : index
    %10 = vector.load %arg4[%c0_6, %c0_7] : memref<128x256xbf16, #tpu.memory_space<vmem>>, vector<128x256xbf16>
    %cst_8 = arith.constant dense<0.000000e+00> : vector<16x256xf32>
    %11 = tpu.matmul %9, %10, %cst_8 {dimension_numbers = #tpu.dot_dimension_numbers<[1], [0], [0], [1], [0, 0, 1, 1], [], []>} : vector<16x128xbf16>, vector<128x256xbf16>, vector<16x256xf32> -> vector<16x256xf32>
    %c0_9 = arith.constant 0 : index
    %c0_10 = arith.constant 0 : index
    %12 = vector.load %arg5[%c0_9, %c0_10] : memref<1x256xf32, #tpu.memory_space<vmem>>, vector<1x256xf32>
    %13 = vector.broadcast %12 : vector<1x256xf32> to vector<16x256xf32>
    %14 = arith.addf %11, %13 : vector<16x256xf32>
    %cst_11 = arith.constant 0.000000e+00 : f32
    %15 = vector.broadcast %cst_11 : f32 to vector<16x256xf32>
    %16 = arith.maximumf %14, %15 : vector<16x256xf32>
    %17 = arith.truncf %16 : vector<16x256xf32> to vector<16x256xbf16>
    %c0_12 = arith.constant 0 : index
    %c0_13 = arith.constant 0 : index
    %18 = vector.load %arg6[%c0_12, %c0_13] : memref<256x128xbf16, #tpu.memory_space<vmem>>, vector<256x128xbf16>
    %cst_14 = arith.constant dense<0.000000e+00> : vector<16x128xf32>
    %19 = tpu.matmul %17, %18, %cst_14 {dimension_numbers = #tpu.dot_dimension_numbers<[1], [0], [0], [1], [0, 0, 1, 1], [], []>} : vector<16x256xbf16>, vector<256x128xbf16>, vector<16x128xf32> -> vector<16x128xf32>
    %c0_15 = arith.constant 0 : index
    %c0_16 = arith.constant 0 : index
    %20 = vector.load %arg7[%c0_15, %c0_16] : memref<1x128xf32, #tpu.memory_space<vmem>>, vector<1x128xf32>
    %21 = vector.broadcast %20 : vector<1x128xf32> to vector<16x128xf32>
    %22 = arith.addf %19, %21 : vector<16x128xf32>
    %23 = arith.truncf %22 : vector<16x128xf32> to vector<16x128xbf16>
    %c0_17 = arith.constant 0 : index
    %c0_18 = arith.constant 0 : index
    %24 = vector.load %arg8[%c0_17, %c0_18] : memref<16x128xbf16, #tpu.memory_space<vmem>>, vector<16x128xbf16>
    tpu.vector_store %arg8[%c0_17, %c0_18], %23 {strides = array<i32>} : memref<16x128xbf16, #tpu.memory_space<vmem>>, vector<16x128xbf16>,
    return
  }
  func.func @transform_0(%arg0: i32) -> (i32, i32) {
    %c0_i32 = arith.constant 0 : i32
    %c0_i32_0 = arith.constant 0 : i32
    return %arg0, %c0_i32 : i32, i32
  }
  func.func @transform_1(%arg0: i32) -> (i32, i32) {
    %c0_i32 = arith.constant 0 : i32
    %c0_i32_0 = arith.constant 0 : i32
    %c0_i32_1 = arith.constant 0 : i32
    return %c0_i32, %c0_i32_0 : i32, i32
  }
  func.func @transform_2(%arg0: i32) -> (i32, i32) {
    %c0_i32 = arith.constant 0 : i32
    %c0_i32_0 = arith.constant 0 : i32
    %c0_i32_1 = arith.constant 0 : i32
    return %c0_i32, %c0_i32_0 : i32, i32
  }
  func.func @transform_3(%arg0: i32) -> (i32, i32) {
    %c0_i32 = arith.constant 0 : i32
    %c0_i32_0 = arith.constant 0 : i32
    %c0_i32_1 = arith.constant 0 : i32
    return %c0_i32, %c0_i32_0 : i32, i32
  }
  func.func @transform_4(%arg0: i32) -> (i32, i32) {
    %c0_i32 = arith.constant 0 : i32
    %c0_i32_0 = arith.constant 0 : i32
    %c0_i32_1 = arith.constant 0 : i32
    return %c0_i32, %c0_i32_0 : i32, i32
  }
  func.func @transform_5(%arg0: i32) -> (i32, i32) {
    %c0_i32 = arith.constant 0 : i32
    %c0_i32_0 = arith.constant 0 : i32
    %c0_i32_1 = arith.constant 0 : i32
    return %c0_i32, %c0_i32_0 : i32, i32
  }
  func.func @transform_6(%arg0: i32) -> (i32, i32) {
    %c0_i32 = arith.constant 0 : i32
    %c0_i32_0 = arith.constant 0 : i32
    %c0_i32_1 = arith.constant 0 : i32
    return %c0_i32, %c0_i32_0 : i32, i32
  }
  func.func @transform_7(%arg0: i32) -> (i32, i32) {
    %c0_i32 = arith.constant 0 : i32
    %c0_i32_0 = arith.constant 0 : i32
    return %arg0, %c0_i32 : i32, i32
  }
}

</mosaic_0001>

<bundles_post_ra>
// kernel: tpu_custom_call.1
= control target key start
LH: loop header
LB: loop body
LE: loop exit
PB: predicated region body
PF: predicated region fallthrough
CT: control target
= control target key end

     0   :  { %12 = vsyncpa [#allocation3], 0  ;;  %s918_s0 = inlined_call_operand.hbm [shape: f32[16,128], index: 0, kind: input, shape index: {}]   ;;  %s919_s1 = inlined_call_operand.hbm [shape: bf16[128,128], index: 1, kind: input, shape index: {}]   ;;  %s920_s2 = inlined_call_operand.vmem [shape: f32[1,128], index: 2, kind: input, shape index: {}]   ;;  %s921_s3 = inlined_call_operand.hbm [shape: bf16[128,256], index: 3, kind: input, shape index: {}]   ;;  %s922_s4 = inlined_call_operand.vmem [shape: f32[1,256], index: 4, kind: input, shape index: {}]   ;;  %s923_s5 = inlined_call_operand.hbm [shape: bf16[256,128], index: 5, kind: input, shape index: {}]   ;;  %s924_s6 = inlined_call_operand.vmem [shape: f32[1,128], index: 6, kind: input, shape index: {}]   ;;  %s925_s7 = inlined_call_operand.hbm [shape: bf16[16,128], index: 7, kind: output, shape index: {}]  }
   0x1   :  { %13 = vsyncpa [#allocation6], 0 }
   0x2   :  { %14 = vsyncpa [#allocation9], 0 }
   0x3   :  { %15 = vsyncpa [#allocation4], 0  ;;  %s833_s24 = smov [#allocation5]  }
   0x4   :  { %s33_s25 = sshll.u32 %s833_s24, 4  ;;  %s34_s25 = int_to_ptr.vmem [resolvable:$true] %s33_s25 }
   0x5   :  { %s733_s26 = scalar_lea.vmem %s34_s25, 1024  ;;  %p738_p1 = scmp.lt.s32.totalorder %s34_s25, %s34_s25 }
   0x6   :  { %p734_p0 = scmp.ne.s32.totalorder %s34_s25, %s733_s26  ;;  %p739_p2 = scmp.lt.s32.totalorder %s733_s26, %s733_s26 }
   0x8   :  { %p740_p3 = por %p739_p2, %p738_p1 }
   0xa   :  { %p741_p4 = pnand %p740_p3, %p734_p0 }
   0xc   :  { %744 = shalt.err (!%p741_p4)
}
   0xd   :  { %s834_s27 = smov 64   ;;  %s835_s28 = smov 4  }
   0xe   :  { %39 = dma.hbm_to_vmem [thread:$0]  %s919_s1, 1024, %s34_s25, [#allocation6], %s834_s27, %s834_s27, %s835_s28  }
   0xf   :  { %s836_s8 = smov [#allocation2]  }
  0x10   :  { %s21_s9 = sshll.u32 %s836_s8, 4  ;;  %s22_s9 = int_to_ptr.vmem [resolvable:$true] %s21_s9 }
  0x11   :  { %s753_s10 = scalar_lea.vmem %s22_s9, 256  ;;  %p758_p6 = scmp.lt.s32.totalorder %s22_s9, %s22_s9 }
  0x12   :  { %p754_p5 = scmp.ne.s32.totalorder %s22_s9, %s753_s10  ;;  %p759_p7 = scmp.lt.s32.totalorder %s753_s10, %s753_s10 }
  0x14   :  { %p760_p8 = por %p759_p7, %p758_p6 }
  0x16   :  { %p761_p9 = pnand %p760_p8, %p754_p5 }
  0x18   :  { %764 = shalt.err (!%p761_p9)
}
  0x19   :  { %s837_s11 = smov 128   ;;  %s838_s12 = smov 8  }
  0x1a   :  { %27 = dma.hbm_to_vmem [thread:$0]  %s918_s0, 256, %s22_s9, [#allocation3], %s837_s11, %s837_s11, %s838_s12  }
  0x1b   :  { %s839_s15 = smov [#allocation7]   ;;  %s840_s17 = smov [#allocation8]  }
  0x1c   :  { %s47_s16 = sshll.u32 %s839_s15, 4  ;;  %s61_s1 = sshll.u32 %s840_s17, 4  ;;  %s48_s16 = int_to_ptr.vmem [resolvable:$true] %s47_s16  ;;  %s62_s1 = int_to_ptr.vmem [resolvable:$true] %s61_s1 }
  0x1d   :  { %s773_s18 = scalar_lea.vmem %s48_s16, 2048  ;;  %p778_p11 = scmp.lt.s32.totalorder %s48_s16, %s48_s16 }
  0x1e   :  { %p774_p10 = scmp.ne.s32.totalorder %s48_s16, %s773_s18  ;;  %p779_p12 = scmp.lt.s32.totalorder %s773_s18, %s773_s18 }
  0x20   :  { %p780_p13 = por %p779_p12, %p778_p11 }
  0x22   :  { %p781_p0 = pnand %p780_p13, %p774_p10 }
  0x24   :  { %784 = shalt.err (!%p781_p0)
}
  0x25   :  { %53 = dma.hbm_to_vmem [thread:$0]  %s921_s3, 2048, %s48_s16, [#allocation6], %s837_s11, %s837_s11, %s838_s12  }
  0x26   :  { %s793_s21 = scalar_lea.vmem %s62_s1, 2048  ;;  %p798_p2 = scmp.lt.s32.totalorder %s62_s1, %s62_s1 }
  0x27   :  { %p794_p1 = scmp.ne.s32.totalorder %s62_s1, %s793_s21  ;;  %p799_p3 = scmp.lt.s32.totalorder %s793_s21, %s793_s21 }
  0x29   :  { %p800_p4 = por %p799_p3, %p798_p2 }
  0x2b   :  { %p801_p5 = pnand %p800_p4, %p794_p1 }
  0x2d   :  { %804 = shalt.err (!%p801_p5)
}
  0x2e   :  { %67 = dma.hbm_to_vmem [thread:$0]  %s923_s5, 2048, %s62_s1, [#allocation9], %s834_s27, %s834_s27, %s835_s28  }
  0x2f   :  { %825 = dma.done.wait [#allocation3], 256  }
  0x30   :  { %826 = vsyncadd [#allocation3], 4294967040 }
  0x31   :  { %827 = dma.done.wait [#allocation6], 3072  }
  0x32   :  { %828 = vsyncadd [#allocation6], 4294964224 }
  0x33   :  { %829 = dma.done.wait [#allocation9], 2048  }
  0x34   :  { %830 = vsyncadd [#allocation9], 4294965248  ;;  %v841_v0 = vmov 0.0   ;;  %vm842_vm0 = vmmov 0   ;;  %v677_v1 = vld [vmem:[#allocation5 + $0x38] sm:$0xff]   ;;  %v678_v2 = vld [vmem:[#allocation5 + $0x30] sm:$0xff]   ;;  %v219_v55 = vlaneseq }
  0x35   :  { %645 = vmatprep.subr.bf16.mxu0 %v841_v0  ;;  %661 = vmatprep.mubr.msk.bf16.mxu0 %vm842_vm0, %v841_v0  ;;  %v679_v3 = vld [vmem:[#allocation5 + $0x28] sm:$0xff]   ;;  %v680_v4 = vld [vmem:[#allocation5 + $0x20] sm:$0xff]   ;;  %v685_v5 = vld [vmem:[#allocation7 + $0x74] ss:$8 sps:$4 sm:$0xff]   ;;  %v843_v28 = vmov 0   ;;  %s844_s25 = smov [#allocation10]  }
  0x36   :  { %646 = vmatpush3.bf16.msra.mxu0 %v677_v1  ;;  %v687_v6 = vld [vmem:[#allocation7 + $0x70] ss:$8 sps:$4 sm:$0xff]   ;;  %v688_v7 = vld [vmem:[#allocation7 + $0x64] ss:$8 sps:$4 sm:$0xff]   ;;  %309 = vmatprep.subr.bf16.mxu1 %v685_v5  ;;  %v690_v8 = vld [vmem:[#allocation7 + $0x60] ss:$8 sps:$4 sm:$0xff]  }
  0x37   :  { %647 = vmatprep.subr.bf16.mxu0 %v841_v0  ;;  %310 = vmatpush1.bf16.msra.mxu1 %v687_v6  ;;  %v691_v9 = vld [vmem:[#allocation7 + $0x54] ss:$8 sps:$4 sm:$0xff]   ;;  %v693_v12 = vld [vmem:[#allocation7 + $0x50] ss:$8 sps:$4 sm:$0xff]   ;;  %v694_v13 = vld [vmem:[#allocation7 + $0x44] ss:$8 sps:$4 sm:$0xff]  }
  0x38   :  { %311 = vmatprep.subr.bf16.mxu1 %v688_v7  ;;  %v681_v10 = vld [vmem:[#allocation5 + $0x18] sm:$0xff]   ;;  %v682_v11 = vld [vmem:[#allocation5 + $0x10] sm:$0xff]   ;;  %v696_v14 = vld [vmem:[#allocation7 + $0x40] ss:$8 sps:$4 sm:$0xff]   ;;  %341 = vmatprep.mubr.bf16.mxu1 %v843_v28  ;;  %v220_v56 = vshrl.u32 %v219_v55, 7  ;;  %s549_s26 = sshll.u32 %s844_s25, 4  ;;  %s550_s26 = int_to_ptr.vmem [resolvable:$true] %s549_s26 }
  0x39   :  { %v697_v15 = vld [vmem:[#allocation7 + $0x34] ss:$8 sps:$4 sm:$0xff]   ;;  %v683_v16 = vld [vmem:[#allocation5 + $0x8] sm:$0xff]   ;;  %v699_v17 = vld [vmem:[#allocation7 + $0x30] ss:$8 sps:$4 sm:$0xff]   ;;  %s805_s29 = scalar_lea.vmem %s550_s26, 128  ;;  %p810_p7 = scmp.lt.s32.totalorder %s550_s26, %s550_s26 }
  0x3a   :  { %648 = vmatpush3.bf16.msra.mxu0 %v678_v2  ;;  %v700_v18 = vld [vmem:[#allocation7 + $0x24] ss:$8 sps:$4 sm:$0xff]   ;;  %v83_v20 = vld [vmem:[#allocation2] sm:$0xff]  ;;  %v84_v21 = vld [vmem:[#allocation2 + $0x8] sm:$0xff]  ;;  %v225_v57 = vsub.s32 1, %v220_v56  ;;  %v221_v58 = vsub.s32 0, %v220_v56  ;;  %p806_p6 = scmp.ne.s32.totalorder %s550_s26, %s805_s29  ;;  %p811_p8 = scmp.lt.s32.totalorder %s805_s29, %s805_s29 }
  0x3b   :  { %649 = vmatprep.subr.bf16.mxu0 %v841_v0  ;;  %312 = vmatpush1.bf16.msra.mxu1 %v690_v8  ;;  %v684_v19 = vld [vmem:[#allocation5] sm:$0xff]   ;;  %v85_v22 = vpack.c.bf16 %v84_v21, %v83_v20  ;;  %v703_v24 = vld [vmem:[#allocation7 + $0x14] ss:$8 sps:$4 sm:$0xff]   ;;  %v705_v25 = vld [vmem:[#allocation7 + $0x10] ss:$8 sps:$4 sm:$0xff]  }
  0x3c   :  { %313 = vmatprep.subr.bf16.mxu1 %v691_v9  ;;  %v702_v23 = vld [vmem:[#allocation7 + $0x20] ss:$8 sps:$4 sm:$0xff]   ;;  %v706_v26 = vld [vmem:[#allocation7 + $0x4] ss:$8 sps:$4 sm:$0xff]   ;;  %v709_v29 = vld [vmem:[#allocation8 + $0x78] sm:$0xff]   ;;  %p812_p9 = por %p811_p8, %p810_p7 }
  0x3d   :  { %v708_v27 = vld [vmem:[#allocation7] ss:$8 sps:$4 sm:$0xff]   ;;  %v710_v30 = vld [vmem:[#allocation8 + $0x38] sm:$0xff]   ;;  %v711_v31 = vld [vmem:[#allocation8 + $0x70] sm:$0xff]  }
  0x3e   :  { %650 = vmatpush3.bf16.msra.mxu0 %v679_v3  ;;  %v712_v32 = vld [vmem:[#allocation8 + $0x30] sm:$0xff]   ;;  %v713_v33 = vld [vmem:[#allocation8 + $0x68] sm:$0xff]   ;;  %v715_v35 = vld [vmem:[#allocation8 + $0x60] sm:$0xff]   ;;  %p813_p10 = pnand %p812_p9, %p806_p6 }
  0x3f   :  { %651 = vmatprep.subr.bf16.mxu0 %v841_v0  ;;  %314 = vmatpush1.bf16.msra.mxu1 %v693_v12  ;;  %v714_v34 = vld [vmem:[#allocation8 + $0x28] sm:$0xff]   ;;  %v716_v36 = vld [vmem:[#allocation8 + $0x20] sm:$0xff]   ;;  %v717_v37 = vld [vmem:[#allocation8 + $0x58] sm:$0xff]  }
  0x40   :  { %315 = vmatprep.subr.bf16.mxu1 %v694_v13  ;;  %v718_v38 = vld [vmem:[#allocation8 + $0x18] sm:$0xff]   ;;  %v563_v39 = vld [vmem:[%s920_s2] ss:$0 sm:$0xff]  ;;  %v721_v51 = vld [vmem:[#allocation8 + $0x48] sm:$0xff]  }
  0x41   :  { %v719_v49 = vld [vmem:[#allocation8 + $0x50] sm:$0xff]   ;;  %v722_v52 = vld [vmem:[#allocation8 + $0x8] sm:$0xff]   ;;  %v723_v53 = vld [vmem:[#allocation8 + $0x40] sm:$0xff]  }
  0x42   :  { %652 = vmatpush3.bf16.msra.mxu0 %v680_v4  ;;  %v720_v50 = vld [vmem:[#allocation8 + $0x10] sm:$0xff]   ;;  %v724_v54 = vld [vmem:[#allocation8] sm:$0xff]  }
  0x43   :  { %653 = vmatprep.subr.bf16.mxu0 %v841_v0  ;;  %316 = vmatpush1.bf16.msra.mxu1 %v696_v14  ;;  %v217_v59 = vld [vmem:[%s922_s4] sm:$0x3] }
  0x44   :  { %317 = vmatprep.subr.bf16.mxu1 %v697_v15  ;;  %v226_v61 = vrot.slane %v217_v59, %v225_v57  ;;  %v222_v62 = vrot.slane %v217_v59, %v221_v58 }
  0x46   :  { %654 = vmatpush3.bf16.msra.mxu0 %v681_v10 }
  0x47   :  { %655 = vmatprep.subr.bf16.mxu0 %v841_v0  ;;  %318 = vmatpush1.bf16.msra.mxu1 %v699_v17 }
  0x48   :  { %319 = vmatprep.subr.bf16.mxu1 %v700_v18 }
  0x4a   :  { %656 = vmatpush3.bf16.msra.mxu0 %v682_v11 }
  0x4b   :  { %657 = vmatprep.subr.bf16.mxu0 %v841_v0  ;;  %320 = vmatpush1.bf16.msra.mxu1 %v702_v23 }
  0x4c   :  { %321 = vmatprep.subr.bf16.mxu1 %v703_v24 }
  0x4e   :  { %658 = vmatpush3.bf16.msra.mxu0 %v683_v16  ;;  %v588_v16 = vld [vmem:[%s924_s6] ss:$0 sm:$0xff] }
  0x4f   :  { %659 = vmatprep.subr.bf16.mxu0 %v841_v0  ;;  %322 = vmatpush1.bf16.msra.mxu1 %v705_v25 }
  0x50   :  { %323 = vmatprep.subr.bf16.mxu1 %v706_v26 }
  0x52   :  { %660 = vmatpush3.bf16.msra.mxu0 %v684_v19 }
  0x53   :  { %324 = vmatpush1.bf16.msra.mxu1 %v708_v27  ;;  %623 = vmatprep.subr.bf16.mxu0 %v709_v29 }
  0x55   :  { %662 = vmatmul.mubr.bf16.vlgmr.msra.gmra.mxu0 %v85_v22 }
  0x56   :  { %624 = vmatpush3.bf16.msra.mxu0 %v710_v30 }
  0x57   :  { %625 = vmatprep.subr.bf16.mxu0 %v711_v31 }
  0x5a   :  { %626 = vmatpush3.bf16.msra.mxu0 %v712_v32 }
  0x5b   :  { %627 = vmatprep.subr.bf16.mxu0 %v713_v33 }
  0x5e   :  { %628 = vmatpush3.bf16.msra.mxu0 %v714_v34 }
  0x5f   :  { %629 = vmatprep.subr.bf16.mxu0 %v715_v35 }
  0x62   :  { %630 = vmatpush3.bf16.msra.mxu0 %v716_v36 }
  0x63   :  { %631 = vmatprep.subr.bf16.mxu0 %v717_v37 }
  0x66   :  { %632 = vmatpush3.bf16.msra.mxu0 %v718_v38 }
  0x67   :  { %633 = vmatprep.subr.bf16.mxu0 %v719_v49 }
  0x6a   :  { %634 = vmatpush3.bf16.msra.mxu0 %v720_v50 }
  0x6b   :  { %635 = vmatprep.subr.bf16.mxu0 %v721_v51 }
  0x6e   :  { %636 = vmatpush3.bf16.msra.mxu0 %v722_v52 }
  0x6f   :  { %637 = vmatprep.subr.bf16.mxu0 %v723_v53 }
  0x72   :  { %638 = vmatpush3.bf16.msra.mxu0 %v724_v54 }
 0x115   :  { %v191_v40 = vpop.f32.mrf.mxu0 }
 0x116   :  { %v192_v42 = vadd.f32 %v563_v39, %v191_v40 }
 0x117   :  { %v663_v41 = vpop.f32.mrf.mxu0 }
 0x118   :  { %v198_v46 = vmax.f32 %v192_v42, 0.0 }
 0x119   :  { %v194_v43 = vpop.f32.mrf.mxu0 }
 0x11a   :  { %v195_v44 = vadd.f32 %v563_v39, %v194_v43 }
 0x11b   :  { %v664_v45 = vpop.f32.mrf.mxu0 }
 0x11c   :  { %v199_v47 = vmax.f32 %v195_v44, 0.0 }
 0x11e   :  { %v200_v48 = vpack.c.bf16 %v199_v47, %v198_v46 }
 0x120   :  { %342 = vmatmul.mubr.bf16.vlgmr.msra.gmra.mxu1 %v200_v48 }
 0x1e0   :  { %v343_v60 = vpop.f32.mrf.mxu1 }
 0x1e1   :  { %v344_v3 = vadd.f32 %v343_v60, %v222_v62 }
 0x1e2   :  { %v345_v63 = vpop.f32.mrf.mxu1 }
 0x1e3   :  { %v346_v1 = vadd.f32 %v345_v63, %v226_v61  ;;  %v352_v9 = vmax.f32 %v344_v3, 0.0 }
 0x1e4   :  { %v347_v0 = vpop.f32.mrf.mxu1 }
 0x1e5   :  { %v348_v2 = vadd.f32 %v347_v0, %v222_v62  ;;  %v353_v7 = vmax.f32 %v346_v1, 0.0 }
 0x1e6   :  { %v349_v4 = vpop.f32.mrf.mxu1 }
 0x1e7   :  { %v350_v5 = vadd.f32 %v349_v4, %v226_v61  ;;  %v354_v6 = vmax.f32 %v348_v2, 0.0 }
 0x1e9   :  { %v355_v8 = vmax.f32 %v350_v5, 0.0  ;;  %v356_v11 = vpack.c.bf16 %v354_v6, %v352_v9 }
 0x1eb   :  { %v357_v10 = vpack.c.bf16 %v355_v8, %v353_v7 }
 0x1ed   :  { %525 = vmatprep.mubr.bf16.mxu0 %v357_v10 }
 0x1ee   :  { %526 = vmatmul.mubr.bf16.vlgmr.msra.gmra.mxu0 %v356_v11 }
 0x2ae   :  { %v639_v12 = vpop.f32.mrf.mxu0 }
 0x2b0   :  { %v640_v13 = vpop.f32.mrf.mxu0 }
 0x2b1   :  { %v641_v15 = vadd.f32 %v640_v13, %v639_v12 }
 0x2b2   :  { %v642_v14 = vpop.f32.mrf.mxu0 }
 0x2b3   :  { %v528_v19 = vadd.f32 %v641_v15, %v588_v16 }
 0x2b4   :  { %v643_v17 = vpop.f32.mrf.mxu0 }
 0x2b5   :  { %v644_v18 = vadd.f32 %v643_v17, %v642_v14 }
 0x2b7   :  { %v531_v20 = vadd.f32 %v644_v18, %v588_v16 }
 0x2b9   :  { %v612_v21 = vpack.c.bf16 %v531_v20, %v528_v19 }
 0x2bb   :  { %613 = vst [vmem:[#allocation10] sm:$0xff] %v612_v21  }
 0x2bc   :  { %816 = shalt.err (!%p813_p10)
}
 0x2bd   :  { %555 = dma.vmem_to_hbm [thread:$0]  %s550_s26, 128, %s925_s7, [#allocation4], %s834_s27, %s834_s27, %s835_s28  }
 0x2be   :  { %831 = dma.done.wait [#allocation4], 128  }
 0x2bf   :  { %832 = vsyncadd [#allocation4], 4294967168 }
 0x2c0   :  { %559 = vsyncpa [#allocation3], 1 }
 0x2c1   :  { %560 = vsyncpa [#allocation6], 1 }
 0x2c2   :  { %561 = vsyncpa [#allocation9], 1 }
 0x2c3   :  { %562 = vsyncpa [#allocation4], 1 }

// kernel: tpu_custom_call.1
= control target key start
LH: loop header
LB: loop body
LE: loop exit
PB: predicated region body
PF: predicated region fallthrough
CT: control target
= control target key end

     0   :  { %12 = vsyncpa [#allocation3], 0  ;;  %s918_s0 = inlined_call_operand.hbm [shape: f32[16,128], index: 0, kind: input, shape index: {}]   ;;  %s919_s1 = inlined_call_operand.hbm [shape: bf16[128,128], index: 1, kind: input, shape index: {}]   ;;  %s920_s2 = inlined_call_operand.vmem [shape: f32[1,128], index: 2, kind: input, shape index: {}]   ;;  %s921_s3 = inlined_call_operand.hbm [shape: bf16[128,256], index: 3, kind: input, shape index: {}]   ;;  %s922_s4 = inlined_call_operand.vmem [shape: f32[1,256], index: 4, kind: input, shape index: {}]   ;;  %s923_s5 = inlined_call_operand.hbm [shape: bf16[256,128], index: 5, kind: input, shape index: {}]   ;;  %s924_s6 = inlined_call_operand.vmem [shape: f32[1,128], index: 6, kind: input, shape index: {}]   ;;  %s925_s7 = inlined_call_operand.hbm [shape: bf16[16,128], index: 7, kind: output, shape index: {}]  }
   0x1   :  { %13 = vsyncpa [#allocation6], 0 }
   0x2   :  { %14 = vsyncpa [#allocation9], 0 }
   0x3   :  { %15 = vsyncpa [#allocation4], 0  ;;  %s833_s24 = smov [#allocation5]  }
   0x4   :  { %s33_s25 = sshll.u32 %s833_s24, 4  ;;  %s34_s25 = int_to_ptr.vmem [resolvable:$true] %s33_s25 }
   0x5   :  { %s733_s26 = scalar_lea.vmem %s34_s25, 1024  ;;  %p738_p1 = scmp.lt.s32.totalorder %s34_s25, %s34_s25 }
   0x6   :  { %p734_p0 = scmp.ne.s32.totalorder %s34_s25, %s733_s26  ;;  %p739_p2 = scmp.lt.s32.totalorder %s733_s26, %s733_s26 }
   0x8   :  { %p740_p3 = por %p739_p2, %p738_p1 }
   0xa   :  { %p741_p4 = pnand %p740_p3, %p734_p0 }
   0xc   :  { %744 = shalt.err (!%p741_p4)
}
   0xd   :  { %s834_s27 = smov 64   ;;  %s835_s28 = smov 4  }
   0xe   :  { %39 = dma.hbm_to_vmem [thread:$0]  %s919_s1, 1024, %s34_s25, [#allocation6], %s834_s27, %s834_s27, %s835_s28  }
   0xf   :  { %s836_s8 = smov [#allocation2]  }
  0x10   :  { %s21_s9 = sshll.u32 %s836_s8, 4  ;;  %s22_s9 = int_to_ptr.vmem [resolvable:$true] %s21_s9 }
  0x11   :  { %s753_s10 = scalar_lea.vmem %s22_s9, 256  ;;  %p758_p6 = scmp.lt.s32.totalorder %s22_s9, %s22_s9 }
  0x12   :  { %p754_p5 = scmp.ne.s32.totalorder %s22_s9, %s753_s10  ;;  %p759_p7 = scmp.lt.s32.totalorder %s753_s10, %s753_s10 }
  0x14   :  { %p760_p8 = por %p759_p7, %p758_p6 }
  0x16   :  { %p761_p9 = pnand %p760_p8, %p754_p5 }
  0x18   :  { %764 = shalt.err (!%p761_p9)
}
  0x19   :  { %s837_s11 = smov 128   ;;  %s838_s12 = smov 8  }
  0x1a   :  { %27 = dma.hbm_to_vmem [thread:$0]  %s918_s0, 256, %s22_s9, [#allocation3], %s837_s11, %s837_s11, %s838_s12  }
  0x1b   :  { %s839_s15 = smov [#allocation7]   ;;  %s840_s17 = smov [#allocation8]  }
  0x1c   :  { %s47_s16 = sshll.u32 %s839_s15, 4  ;;  %s61_s1 = sshll.u32 %s840_s17, 4  ;;  %s48_s16 = int_to_ptr.vmem [resolvable:$true] %s47_s16  ;;  %s62_s1 = int_to_ptr.vmem [resolvable:$true] %s61_s1 }
  0x1d   :  { %s773_s18 = scalar_lea.vmem %s48_s16, 2048  ;;  %p778_p11 = scmp.lt.s32.totalorder %s48_s16, %s48_s16 }
  0x1e   :  { %p774_p10 = scmp.ne.s32.totalorder %s48_s16, %s773_s18  ;;  %p779_p12 = scmp.lt.s32.totalorder %s773_s18, %s773_s18 }
  0x20   :  { %p780_p13 = por %p779_p12, %p778_p11 }
  0x22   :  { %p781_p0 = pnand %p780_p13, %p774_p10 }
  0x24   :  { %784 = shalt.err (!%p781_p0)
}
  0x25   :  { %53 = dma.hbm_to_vmem [thread:$0]  %s921_s3, 2048, %s48_s16, [#allocation6], %s837_s11, %s837_s11, %s838_s12  }
  0x26   :  { %s793_s21 = scalar_lea.vmem %s62_s1, 2048  ;;  %p798_p2 = scmp.lt.s32.totalorder %s62_s1, %s62_s1 }
  0x27   :  { %p794_p1 = scmp.ne.s32.totalorder %s62_s1, %s793_s21  ;;  %p799_p3 = scmp.lt.s32.totalorder %s793_s21, %s793_s21 }
  0x29   :  { %p800_p4 = por %p799_p3, %p798_p2 }
  0x2b   :  { %p801_p5 = pnand %p800_p4, %p794_p1 }
  0x2d   :  { %804 = shalt.err (!%p801_p5)
}
  0x2e   :  { %67 = dma.hbm_to_vmem [thread:$0]  %s923_s5, 2048, %s62_s1, [#allocation9], %s834_s27, %s834_s27, %s835_s28  }
  0x2f   :  { %825 = dma.done.wait [#allocation3], 256  }
  0x30   :  { %826 = vsyncadd [#allocation3], 4294967040 }
  0x31   :  { %827 = dma.done.wait [#allocation6], 3072  }
  0x32   :  { %828 = vsyncadd [#allocation6], 4294964224 }
  0x33   :  { %829 = dma.done.wait [#allocation9], 2048  }
  0x34   :  { %830 = vsyncadd [#allocation9], 4294965248  ;;  %v841_v0 = vmov 0.0   ;;  %vm842_vm0 = vmmov 0   ;;  %v677_v1 = vld [vmem:[#allocation5 + $0x38] sm:$0xff]   ;;  %v678_v2 = vld [vmem:[#allocation5 + $0x30] sm:$0xff]   ;;  %v219_v55 = vlaneseq }
  0x35   :  { %645 = vmatprep.subr.bf16.mxu0 %v841_v0  ;;  %661 = vmatprep.mubr.msk.bf16.mxu0 %vm842_vm0, %v841_v0  ;;  %v679_v3 = vld [vmem:[#allocation5 + $0x28] sm:$0xff]   ;;  %v680_v4 = vld [vmem:[#allocation5 + $0x20] sm:$0xff]   ;;  %v685_v5 = vld [vmem:[#allocation7 + $0x74] ss:$8 sps:$4 sm:$0xff]   ;;  %v843_v28 = vmov 0   ;;  %s844_s25 = smov [#allocation10]  }
  0x36   :  { %646 = vmatpush3.bf16.msra.mxu0 %v677_v1  ;;  %v687_v6 = vld [vmem:[#allocation7 + $0x70] ss:$8 sps:$4 sm:$0xff]   ;;  %v688_v7 = vld [vmem:[#allocation7 + $0x64] ss:$8 sps:$4 sm:$0xff]   ;;  %309 = vmatprep.subr.bf16.mxu1 %v685_v5  ;;  %v690_v8 = vld [vmem:[#allocation7 + $0x60] ss:$8 sps:$4 sm:$0xff]  }
  0x37   :  { %647 = vmatprep.subr.bf16.mxu0 %v841_v0  ;;  %310 = vmatpush1.bf16.msra.mxu1 %v687_v6  ;;  %v691_v9 = vld [vmem:[#allocation7 + $0x54] ss:$8 sps:$4 sm:$0xff]   ;;  %v693_v12 = vld [vmem:[#allocation7 + $0x50] ss:$8 sps:$4 sm:$0xff]   ;;  %v694_v13 = vld [vmem:[#allocation7 + $0x44] ss:$8 sps:$4 sm:$0xff]  }
  0x38   :  { %311 = vmatprep.subr.bf16.mxu1 %v688_v7  ;;  %v681_v10 = vld [vmem:[#allocation5 + $0x18] sm:$0xff]   ;;  %v682_v11 = vld [vmem:[#allocation5 + $0x10] sm:$0xff]   ;;  %v696_v14 = vld [vmem:[#allocation7 + $0x40] ss:$8 sps:$4 sm:$0xff]   ;;  %341 = vmatprep.mubr.bf16.mxu1 %v843_v28  ;;  %v220_v56 = vshrl.u32 %v219_v55, 7  ;;  %s549_s26 = sshll.u32 %s844_s25, 4  ;;  %s550_s26 = int_to_ptr.vmem [resolvable:$true] %s549_s26 }
  0x39   :  { %v697_v15 = vld [vmem:[#allocation7 + $0x34] ss:$8 sps:$4 sm:$0xff]   ;;  %v683_v16 = vld [vmem:[#allocation5 + $0x8] sm:$0xff]   ;;  %v699_v17 = vld [vmem:[#allocation7 + $0x30] ss:$8 sps:$4 sm:$0xff]   ;;  %s805_s29 = scalar_lea.vmem %s550_s26, 128  ;;  %p810_p7 = scmp.lt.s32.totalorder %s550_s26, %s550_s26 }
  0x3a   :  { %648 = vmatpush3.bf16.msra.mxu0 %v678_v2  ;;  %v700_v18 = vld [vmem:[#allocation7 + $0x24] ss:$8 sps:$4 sm:$0xff]   ;;  %v83_v20 = vld [vmem:[#allocation2] sm:$0xff]  ;;  %v84_v21 = vld [vmem:[#allocation2 + $0x8] sm:$0xff]  ;;  %v225_v57 = vsub.s32 1, %v220_v56  ;;  %v221_v58 = vsub.s32 0, %v220_v56  ;;  %p806_p6 = scmp.ne.s32.totalorder %s550_s26, %s805_s29  ;;  %p811_p8 = scmp.lt.s32.totalorder %s805_s29, %s805_s29 }
  0x3b   :  { %649 = vmatprep.subr.bf16.mxu0 %v841_v0  ;;  %312 = vmatpush1.bf16.msra.mxu1 %v690_v8  ;;  %v684_v19 = vld [vmem:[#allocation5] sm:$0xff]   ;;  %v85_v22 = vpack.c.bf16 %v84_v21, %v83_v20  ;;  %v703_v24 = vld [vmem:[#allocation7 + $0x14] ss:$8 sps:$4 sm:$0xff]   ;;  %v705_v25 = vld [vmem:[#allocation7 + $0x10] ss:$8 sps:$4 sm:$0xff]  }
  0x3c   :  { %313 = vmatprep.subr.bf16.mxu1 %v691_v9  ;;  %v702_v23 = vld [vmem:[#allocation7 + $0x20] ss:$8 sps:$4 sm:$0xff]   ;;  %v706_v26 = vld [vmem:[#allocation7 + $0x4] ss:$8 sps:$4 sm:$0xff]   ;;  %v709_v29 = vld [vmem:[#allocation8 + $0x78] sm:$0xff]   ;;  %p812_p9 = por %p811_p8, %p810_p7 }
  0x3d   :  { %v708_v27 = vld [vmem:[#allocation7] ss:$8 sps:$4 sm:$0xff]   ;;  %v710_v30 = vld [vmem:[#allocation8 + $0x38] sm:$0xff]   ;;  %v711_v31 = vld [vmem:[#allocation8 + $0x70] sm:$0xff]  }
  0x3e   :  { %650 = vmatpush3.bf16.msra.mxu0 %v679_v3  ;;  %v712_v32 = vld [vmem:[#allocation8 + $0x30] sm:$0xff]   ;;  %v713_v33 = vld [vmem:[#allocation8 + $0x68] sm:$0xff]   ;;  %v715_v35 = vld [vmem:[#allocation8 + $0x60] sm:$0xff]   ;;  %p813_p10 = pnand %p812_p9, %p806_p6 }
  0x3f   :  { %651 = vmatprep.subr.bf16.mxu0 %v841_v0  ;;  %314 = vmatpush1.bf16.msra.mxu1 %v693_v12  ;;  %v714_v34 = vld [vmem:[#allocation8 + $0x28] sm:$0xff]   ;;  %v716_v36 = vld [vmem:[#allocation8 + $0x20] sm:$0xff]   ;;  %v717_v37 = vld [vmem:[#allocation8 + $0x58] sm:$0xff]  }
  0x40   :  { %315 = vmatprep.subr.bf16.mxu1 %v694_v13  ;;  %v718_v38 = vld [vmem:[#allocation8 + $0x18] sm:$0xff]   ;;  %v563_v39 = vld [vmem:[%s920_s2] ss:$0 sm:$0xff]  ;;  %v721_v51 = vld [vmem:[#allocation8 + $0x48] sm:$0xff]  }
  0x41   :  { %v719_v49 = vld [vmem:[#allocation8 + $0x50] sm:$0xff]   ;;  %v722_v52 = vld [vmem:[#allocation8 + $0x8] sm:$0xff]   ;;  %v723_v53 = vld [vmem:[#allocation8 + $0x40] sm:$0xff]  }
  0x42   :  { %652 = vmatpush3.bf16.msra.mxu0 %v680_v4  ;;  %v720_v50 = vld [vmem:[#allocation8 + $0x10] sm:$0xff]   ;;  %v724_v54 = vld [vmem:[#allocation8] sm:$0xff]  }
  0x43   :  { %653 = vmatprep.subr.bf16.mxu0 %v841_v0  ;;  %316 = vmatpush1.bf16.msra.mxu1 %v696_v14  ;;  %v217_v59 = vld [vmem:[%s922_s4] sm:$0x3] }
  0x44   :  { %317 = vmatprep.subr.bf16.mxu1 %v697_v15  ;;  %v226_v61 = vrot.slane %v217_v59, %v225_v57  ;;  %v222_v62 = vrot.slane %v217_v59, %v221_v58 }
  0x46   :  { %654 = vmatpush3.bf16.msra.mxu0 %v681_v10 }
  0x47   :  { %655 = vmatprep.subr.bf16.mxu0 %v841_v0  ;;  %318 = vmatpush1.bf16.msra.mxu1 %v699_v17 }
  0x48   :  { %319 = vmatprep.subr.bf16.mxu1 %v700_v18 }
  0x4a   :  { %656 = vmatpush3.bf16.msra.mxu0 %v682_v11 }
  0x4b   :  { %657 = vmatprep.subr.bf16.mxu0 %v841_v0  ;;  %320 = vmatpush1.bf16.msra.mxu1 %v702_v23 }
  0x4c   :  { %321 = vmatprep.subr.bf16.mxu1 %v703_v24 }
  0x4e   :  { %658 = vmatpush3.bf16.msra.mxu0 %v683_v16  ;;  %v588_v16 = vld [vmem:[%s924_s6] ss:$0 sm:$0xff] }
  0x4f   :  { %659 = vmatprep.subr.bf16.mxu0 %v841_v0  ;;  %322 = vmatpush1.bf16.msra.mxu1 %v705_v25 }
  0x50   :  { %323 = vmatprep.subr.bf16.mxu1 %v706_v26 }
  0x52   :  { %660 = vmatpush3.bf16.msra.mxu0 %v684_v19 }
  0x53   :  { %324 = vmatpush1.bf16.msra.mxu1 %v708_v27  ;;  %623 = vmatprep.subr.bf16.mxu0 %v709_v29 }
  0x55   :  { %662 = vmatmul.mubr.bf16.vlgmr.msra.gmra.mxu0 %v85_v22 }
  0x56   :  { %624 = vmatpush3.bf16.msra.mxu0 %v710_v30 }
  0x57   :  { %625 = vmatprep.subr.bf16.mxu0 %v711_v31 }
  0x5a   :  { %626 = vmatpush3.bf16.msra.mxu0 %v712_v32 }
  0x5b   :  { %627 = vmatprep.subr.bf16.mxu0 %v713_v33 }
  0x5e   :  { %628 = vmatpush3.bf16.msra.mxu0 %v714_v34 }
  0x5f   :  { %629 = vmatprep.subr.bf16.mxu0 %v715_v35 }
  0x62   :  { %630 = vmatpush3.bf16.msra.mxu0 %v716_v36 }
  0x63   :  { %631 = vmatprep.subr.bf16.mxu0 %v717_v37 }
  0x66   :  { %632 = vmatpush3.bf16.msra.mxu0 %v718_v38 }
  0x67   :  { %633 = vmatprep.subr.bf16.mxu0 %v719_v49 }
  0x6a   :  { %634 = vmatpush3.bf16.msra.mxu0 %v720_v50 }
  0x6b   :  { %635 = vmatprep.subr.bf16.mxu0 %v721_v51 }
  0x6e   :  { %636 = vmatpush3.bf16.msra.mxu0 %v722_v52 }
  0x6f   :  { %637 = vmatprep.subr.bf16.mxu0 %v723_v53 }
  0x72   :  { %638 = vmatpush3.bf16.msra.mxu0 %v724_v54 }
 0x115   :  { %v191_v40 = vpop.f32.mrf.mxu0 }
 0x116   :  { %v192_v42 = vadd.f32 %v563_v39, %v191_v40 }
 0x117   :  { %v663_v41 = vpop.f32.mrf.mxu0 }
 0x118   :  { %v198_v46 = vmax.f32 %v192_v42, 0.0 }
 0x119   :  { %v194_v43 = vpop.f32.mrf.mxu0 }
 0x11a   :  { %v195_v44 = vadd.f32 %v563_v39, %v194_v43 }
 0x11b   :  { %v664_v45 = vpop.f32.mrf.mxu0 }
 0x11c   :  { %v199_v47 = vmax.f32 %v195_v44, 0.0 }
 0x11e   :  { %v200_v48 = vpack.c.bf16 %v199_v47, %v198_v46 }
 0x120   :  { %342 = vmatmul.mubr.bf16.vlgmr.msra.gmra.mxu1 %v200_v48 }
 0x1e0   :  { %v343_v60 = vpop.f32.mrf.mxu1 }
 0x1e1   :  { %v344_v3 = vadd.f32 %v343_v60, %v222_v62 }
 0x1e2   :  { %v345_v63 = vpop.f32.mrf.mxu1 }
 0x1e3   :  { %v346_v1 = vadd.f32 %v345_v63, %v226_v61  ;;  %v352_v9 = vmax.f32 %v344_v3, 0.0 }
 0x1e4   :  { %v347_v0 = vpop.f32.mrf.mxu1 }
 0x1e5   :  { %v348_v2 = vadd.f32 %v347_v0, %v222_v62  ;;  %v353_v7 = vmax.f32 %v346_v1, 0.0 }
 0x1e6   :  { %v349_v4 = vpop.f32.mrf.mxu1 }
 0x1e7   :  { %v350_v5 = vadd.f32 %v349_v4, %v226_v61  ;;  %v354_v6 = vmax.f32 %v348_v2, 0.0 }
 0x1e9   :  { %v355_v8 = vmax.f32 %v350_v5, 0.0  ;;  %v356_v11 = vpack.c.bf16 %v354_v6, %v352_v9 }
 0x1eb   :  { %v357_v10 = vpack.c.bf16 %v355_v8, %v353_v7 }
 0x1ed   :  { %525 = vmatprep.mubr.bf16.mxu0 %v357_v10 }
 0x1ee   :  { %526 = vmatmul.mubr.bf16.vlgmr.msra.gmra.mxu0 %v356_v11 }
 0x2ae   :  { %v639_v12 = vpop.f32.mrf.mxu0 }
 0x2b0   :  { %v640_v13 = vpop.f32.mrf.mxu0 }
 0x2b1   :  { %v641_v15 = vadd.f32 %v640_v13, %v639_v12 }
 0x2b2   :  { %v642_v14 = vpop.f32.mrf.mxu0 }
 0x2b3   :  { %v528_v19 = vadd.f32 %v641_v15, %v588_v16 }
 0x2b4   :  { %v643_v17 = vpop.f32.mrf.mxu0 }
 0x2b5   :  { %v644_v18 = vadd.f32 %v643_v17, %v642_v14 }
 0x2b7   :  { %v531_v20 = vadd.f32 %v644_v18, %v588_v16 }
 0x2b9   :  { %v612_v21 = vpack.c.bf16 %v531_v20, %v528_v19 }
 0x2bb   :  { %613 = vst [vmem:[#allocation10] sm:$0xff] %v612_v21  }
 0x2bc   :  { %816 = shalt.err (!%p813_p10)
}
 0x2bd   :  { %555 = dma.vmem_to_hbm [thread:$0]  %s550_s26, 128, %s925_s7, [#allocation4], %s834_s27, %s834_s27, %s835_s28  }
 0x2be   :  { %831 = dma.done.wait [#allocation4], 128  }
 0x2bf   :  { %832 = vsyncadd [#allocation4], 4294967168 }
 0x2c0   :  { %559 = vsyncpa [#allocation3], 1 }
 0x2c1   :  { %560 = vsyncpa [#allocation6], 1 }
 0x2c2   :  { %561 = vsyncpa [#allocation9], 1 }
 0x2c3   :  { %562 = vsyncpa [#allocation4], 1 }

</bundles_post_ra>
